<compile_context>
chip_gen: v6e
topology: v6e:2x2x1
jax: 0.10.0
libtpu: 0.0.40
codegen_flags: <defaults>
</compile_context>

<pallas_src>
import jax
import jax.numpy as jnp
from jax import lax
from jax.experimental import pallas as pl
from jax.experimental.pallas import tpu as pltpu


def _round_up(x, m):
    return ((x + m - 1) // m) * m


def masked_linear_kernel(x_ref, w_ref, m_ref, b_ref, o_ref, acc_ref):
    k = pl.program_id(2)

    @pl.when(k == 0)
    def _init():
        acc_ref[...] = jnp.zeros_like(acc_ref)

    # Apply the mask in the weight's native dtype (no f32 mask stream / upcast).
    wm = jnp.where(m_ref[...] != 0, w_ref[...], jnp.zeros_like(w_ref[...]))

    # Contract D_in of both operands directly on the MXU:
    #   x (tm, tk) . wm (tn, tk) -> (tm, tn)   (no explicit transpose)
    acc_ref[...] += lax.dot_general(
        x_ref[...], wm,
        dimension_numbers=(((1,), (1,)), ((), ())),
        preferred_element_type=jnp.float32,
    )

    @pl.when(k == pl.num_programs(2) - 1)
    def _finalize():
        o_ref[...] = (acc_ref[...] + b_ref[...].astype(jnp.float32)).astype(o_ref.dtype)


def masked_linear(x, weight, mask, bias, *, tm=None, tn=None, tk=None):
    """output = x @ (weight * mask).T + bias   (matches F.linear semantics)."""
    orig_shape = x.shape
    D_in = orig_shape[-1]
    D_out = weight.shape[0]
    x2 = x.reshape(-1, D_in)
    B = x2.shape[0]

    # Tile sizes: sublane-aligned batch tile, 128-lane-aligned N/K tiles.
    tm = tm if tm is not None else min(256, _round_up(B, 8))
    tn = tn if tn is not None else min(512, _round_up(D_out, 128))
    tk = tk if tk is not None else min(512, _round_up(D_in, 128))

    Bp = _round_up(B, tm)
    Np = _round_up(D_out, tn)
    Kp = _round_up(D_in, tk)

    # Zero-padding the contracting dim contributes 0 to the accumulation;
    # padded output rows/cols are sliced away below.
    x_p = x2 if (Bp == B and Kp == D_in) else jnp.pad(
        x2, ((0, Bp - B), (0, Kp - D_in)))
    w_p = weight if (Np == D_out and Kp == D_in) else jnp.pad(
        weight, ((0, Np - D_out), (0, Kp - D_in)))
    m_i8 = (mask != 0).astype(jnp.int8)
    m_p = m_i8 if (Np == D_out and Kp == D_in) else jnp.pad(
        m_i8, ((0, Np - D_out), (0, Kp - D_in)))
    b_p = (bias if Np == D_out else jnp.pad(bias, (0, Np - D_out))).reshape(1, Np)

    grid = (Bp // tm, Np // tn, Kp // tk)

    out = pl.pallas_call(
        masked_linear_kernel,
        out_shape=jax.ShapeDtypeStruct((Bp, Np), x.dtype),
        grid_spec=pltpu.PrefetchScalarGridSpec(
            num_scalar_prefetch=0,
            grid=grid,
            in_specs=[
                pl.BlockSpec((tm, tk), lambda i, j, k: (i, k)),   # x
                pl.BlockSpec((tn, tk), lambda i, j, k: (j, k)),   # weight
                pl.BlockSpec((tn, tk), lambda i, j, k: (j, k)),   # mask (int8)
                pl.BlockSpec((1, tn), lambda i, j, k: (0, j)),    # bias
            ],
            out_specs=pl.BlockSpec((tm, tn), lambda i, j, k: (i, j)),
            scratch_shapes=[pltpu.VMEM((tm, tn), jnp.float32)],
        ),
        compiler_params=pltpu.CompilerParams(
            dimension_semantics=("parallel", "parallel", "arbitrary")),
    )(x_p, w_p, m_p, b_p)

    out = out[:B, :D_out]
    return out.reshape(*orig_shape[:-1], D_out)


if __name__ == "__main__":
    key = jax.random.PRNGKey(0)
    k_x, k_w, k_b = jax.random.split(key, 3)

    B, D_in, D_out = 8, 32, 16

    x = jax.random.normal(k_x, (B, D_in), dtype=jnp.float32)

    # Deterministic parameter init (mimics nn.Linear's uniform init range).
    bound = 1.0 / jnp.sqrt(D_in)
    weight = jax.random.uniform(k_w, (D_out, D_in), minval=-bound, maxval=bound,
                                dtype=jnp.float32)
    bias = jax.random.uniform(k_b, (D_out,), minval=-bound, maxval=bound,
                              dtype=jnp.float32)

    # Deterministic autoregressive-style (MADE-like) mask buffer.
    in_deg = jnp.arange(D_in) % (D_in - 1) + 1            # (D_in,)
    out_deg = jnp.arange(D_out) % (D_in - 1) + 1          # (D_out,)
    mask = (out_deg[:, None] >= in_deg[None, :]).astype(jnp.float32)  # (D_out, D_in)

    out = masked_linear(x, weight, mask, bias)
    out = jax.block_until_ready(out)

    # Reference check against plain-JAX F.linear semantics.
    ref = x @ (weight * mask).T + bias
    assert out.shape == (B, D_out)
    assert jnp.allclose(out, ref, atol=1e-5, rtol=1e-5), "mismatch vs reference"

    print("KERNEL_OK")
</pallas_src>

<mosaic_0001>
module attributes {stable_mosaic.version = 11 : i64} {
  func.func @masked_linear_kernel(%arg0: i32, %arg1: i32, %arg2: i32, %arg3: memref<8x128xf32, #tpu.memory_space<vmem>>, %arg4: memref<128x128xf32, #tpu.memory_space<vmem>>, %arg5: memref<128x128xi8, #tpu.memory_space<vmem>>, %arg6: memref<1x128xf32, #tpu.memory_space<vmem>>, %arg7: memref<8x128xf32, #tpu.memory_space<vmem>>, %arg8: memref<8x128xf32, #tpu.memory_space<vmem>>) attributes {dimension_semantics = [#tpu.dimension_semantics<parallel>, #tpu.dimension_semantics<parallel>, #tpu.dimension_semantics<arbitrary>], iteration_bounds = array<i64: 1, 1, 1>, scalar_prefetch = 0 : i64, scratch_operands = 1 : i64, tpu.core_type = #tpu.core_type<tc>, window_params = [{transform_indices = @transform_0, window_bounds = array<i64: 8, 128>}, {transform_indices = @transform_1, window_bounds = array<i64: 128, 128>}, {transform_indices = @transform_2, window_bounds = array<i64: 128, 128>}, {transform_indices = @transform_3, window_bounds = array<i64: 1, 128>}, {transform_indices = @transform_4, window_bounds = array<i64: 8, 128>}]} {
    %c0_i32 = arith.constant 0 : i32
    %0 = arith.cmpi eq, %arg2, %c0_i32 : i32
    %1 = arith.extui %0 : i1 to i32
    %c0_i32_0 = arith.constant 0 : i32
    %2 = arith.cmpi ne, %1, %c0_i32_0 : i32
    scf.if %2 {
      %cst_13 = arith.constant 0.000000e+00 : f32
      %17 = vector.broadcast %cst_13 : f32 to vector<8x128xf32>
      %c0_14 = arith.constant 0 : index
      %c0_15 = arith.constant 0 : index
      %18 = vector.load %arg8[%c0_14, %c0_15] : memref<8x128xf32, #tpu.memory_space<vmem>>, vector<8x128xf32>
      tpu.vector_store %arg8[%c0_14, %c0_15], %17 {strides = array<i32>} : memref<8x128xf32, #tpu.memory_space<vmem>>, vector<8x128xf32>,
    } else {
    }
    %c0 = arith.constant 0 : index
    %c0_1 = arith.constant 0 : index
    %3 = vector.load %arg5[%c0, %c0_1] : memref<128x128xi8, #tpu.memory_space<vmem>>, vector<128x128xi8>
    %c0_i8 = arith.constant 0 : i8
    %4 = vector.broadcast %c0_i8 : i8 to vector<128x128xi8>
    %5 = arith.cmpi ne, %3, %4 : vector<128x128xi8>
    %c0_2 = arith.constant 0 : index
    %c0_3 = arith.constant 0 : index
    %6 = vector.load %arg4[%c0_2, %c0_3] : memref<128x128xf32, #tpu.memory_space<vmem>>, vector<128x128xf32>
    %cst = arith.constant 0.000000e+00 : f32
    %7 = vector.broadcast %cst : f32 to vector<128x128xf32>
    %8 = arith.select %5, %6, %7 : vector<128x128xi1>, vector<128x128xf32>
    %c0_4 = arith.constant 0 : index
    %c0_5 = arith.constant 0 : index
    %9 = vector.load %arg8[%c0_4, %c0_5] : memref<8x128xf32, #tpu.memory_space<vmem>>, vector<8x128xf32>
    %c0_6 = arith.constant 0 : index
    %c0_7 = arith.constant 0 : index
    %10 = vector.load %arg3[%c0_6, %c0_7] : memref<8x128xf32, #tpu.memory_space<vmem>>, vector<8x128xf32>
    %cst_8 = arith.constant dense<0.000000e+00> : vector<8x128xf32>
    %11 = tpu.matmul %10, %8, %cst_8 {dimension_numbers = #tpu.dot_dimension_numbers<[1], [1], [0], [0], [0, 0, 1, 0], [], []>} : vector<8x128xf32>, vector<128x128xf32>, vector<8x128xf32> -> vector<8x128xf32>
    %12 = arith.addf %9, %11 : vector<8x128xf32>
    %c0_9 = arith.constant 0 : index
    %c0_10 = arith.constant 0 : index
    %13 = vector.load %arg8[%c0_9, %c0_10] : memref<8x128xf32, #tpu.memory_space<vmem>>, vector<8x128xf32>
    tpu.vector_store %arg8[%c0_9, %c0_10], %12 {strides = array<i32>} : memref<8x128xf32, #tpu.memory_space<vmem>>, vector<8x128xf32>,
    %c0_i32_11 = arith.constant 0 : i32
    %14 = arith.cmpi eq, %arg2, %c0_i32_11 : i32
    %15 = arith.extui %14 : i1 to i32
    %c0_i32_12 = arith.constant 0 : i32
    %16 = arith.cmpi ne, %15, %c0_i32_12 : i32
    scf.if %16 {
      %c0_13 = arith.constant 0 : index
      %c0_14 = arith.constant 0 : index
      %17 = vector.load %arg8[%c0_13, %c0_14] : memref<8x128xf32, #tpu.memory_space<vmem>>, vector<8x128xf32>
      %c0_15 = arith.constant 0 : index
      %c0_16 = arith.constant 0 : index
      %18 = vector.load %arg6[%c0_15, %c0_16] : memref<1x128xf32, #tpu.memory_space<vmem>>, vector<1x128xf32>
      %19 = vector.broadcast %18 : vector<1x128xf32> to vector<8x128xf32>
      %20 = arith.addf %17, %19 : vector<8x128xf32>
      %c0_17 = arith.constant 0 : index
      %c0_18 = arith.constant 0 : index
      %21 = vector.load %arg7[%c0_17, %c0_18] : memref<8x128xf32, #tpu.memory_space<vmem>>, vector<8x128xf32>
      tpu.vector_store %arg7[%c0_17, %c0_18], %20 {strides = array<i32>} : memref<8x128xf32, #tpu.memory_space<vmem>>, vector<8x128xf32>,
    } else {
    }
    return
  }
  func.func @transform_0(%arg0: i32, %arg1: i32, %arg2: i32) -> (i32, i32) {
    %c0_i32 = arith.constant 0 : i32
    return %arg0, %arg2 : i32, i32
  }
  func.func @transform_1(%arg0: i32, %arg1: i32, %arg2: i32) -> (i32, i32) {
    %c0_i32 = arith.constant 0 : i32
    return %arg1, %arg2 : i32, i32
  }
  func.func @transform_2(%arg0: i32, %arg1: i32, %arg2: i32) -> (i32, i32) {
    %c0_i32 = arith.constant 0 : i32
    return %arg1, %arg2 : i32, i32
  }
  func.func @transform_3(%arg0: i32, %arg1: i32, %arg2: i32) -> (i32, i32) {
    %c0_i32 = arith.constant 0 : i32
    %c0_i32_0 = arith.constant 0 : i32
    return %c0_i32, %arg1 : i32, i32
  }
  func.func @transform_4(%arg0: i32, %arg1: i32, %arg2: i32) -> (i32, i32) {
    %c0_i32 = arith.constant 0 : i32
    return %arg0, %arg1 : i32, i32
  }
}

</mosaic_0001>

<bundles_post_ra>
// kernel: tpu_custom_call.1
= control target key start
LH: loop header
LB: loop body
LE: loop exit
PB: predicated region body
PF: predicated region fallthrough
CT: control target
= control target key end

     0   :  { %9 = vsyncpa [#allocation4], 0  ;;  %s573_s0 = inlined_call_operand.hbm [shape: f32[8,128], index: 0, kind: input, shape index: {}]   ;;  %s574_s1 = inlined_call_operand.hbm [shape: f32[128,128], index: 1, kind: input, shape index: {}]   ;;  %s575_s2 = inlined_call_operand.hbm [shape: s8[128,128], index: 2, kind: input, shape index: {}]   ;;  %s576_s3 = inlined_call_operand.vmem [shape: f32[1,128], index: 3, kind: input, shape index: {}]   ;;  %s577_s4 = inlined_call_operand.hbm [shape: f32[8,128], index: 4, kind: output, shape index: {}]  }
   0x1   :  { %10 = vsyncpa [#allocation7], 0 }
   0x2   :  { %11 = vsyncpa [#allocation5], 0  ;;  %s487_s15 = smov [#allocation6]  }
   0x3   :  { %s27_s16 = sshll.u32 %s487_s15, 4  ;;  %s28_s16 = int_to_ptr.vmem [resolvable:$true] %s27_s16 }
   0x4   :  { %s409_s17 = scalar_lea.vmem %s28_s16, 2048  ;;  %p414_p1 = scmp.lt.s32.totalorder %s28_s16, %s28_s16 }
   0x5   :  { %p410_p0 = scmp.ne.s32.totalorder %s28_s16, %s409_s17  ;;  %p415_p2 = scmp.lt.s32.totalorder %s409_s17, %s409_s17 }
   0x7   :  { %p416_p3 = por %p415_p2, %p414_p1 }
   0x9   :  { %p417_p4 = pnand %p416_p3, %p410_p0 }
   0xb   :  { %420 = shalt.err (!%p417_p4)
}
   0xc   :  { %s488_s18 = smov 128   ;;  %s489_s19 = smov 8  }
   0xd   :  { %33 = dma.hbm_to_vmem [thread:$0]  %s574_s1, 2048, %s28_s16, [#allocation7], %s488_s18, %s488_s18, %s489_s19  }
   0xe   :  { %s490_s22 = smov [#allocation3]   ;;  %s491_s24 = smov [#allocation8]  }
   0xf   :  { %s18_s23 = sshll.u32 %s490_s22, 4  ;;  %s39_s25 = sshll.u32 %s491_s24, 4  ;;  %s19_s23 = int_to_ptr.vmem [resolvable:$true] %s18_s23  ;;  %s40_s25 = int_to_ptr.vmem [resolvable:$true] %s39_s25 }
  0x10   :  { %s429_s26 = scalar_lea.vmem %s19_s23, 128  ;;  %p434_p6 = scmp.lt.s32.totalorder %s19_s23, %s19_s23 }
  0x11   :  { %p430_p5 = scmp.ne.s32.totalorder %s19_s23, %s429_s26  ;;  %p435_p7 = scmp.lt.s32.totalorder %s429_s26, %s429_s26 }
  0x13   :  { %p436_p8 = por %p435_p7, %p434_p6 }
  0x15   :  { %p437_p9 = pnand %p436_p8, %p430_p5 }
  0x17   :  { %440 = shalt.err (!%p437_p9)
}
  0x18   :  { %21 = dma.hbm_to_vmem [thread:$0]  %s573_s0, 128, %s19_s23, [#allocation4]  }
  0x19   :  { %s449_s29 = scalar_lea.vmem %s40_s25, 512  ;;  %p454_p11 = scmp.lt.s32.totalorder %s40_s25, %s40_s25 }
  0x1a   :  { %p450_p10 = scmp.ne.s32.totalorder %s40_s25, %s449_s29  ;;  %p455_p12 = scmp.lt.s32.totalorder %s449_s29, %s449_s29 }
  0x1c   :  { %p456_p13 = por %p455_p12, %p454_p11 }
  0x1e   :  { %p457_p0 = pnand %p456_p13, %p450_p10 }
  0x20   :  { %460 = shalt.err (!%p457_p0)
}
  0x21   :  { %45 = dma.hbm_to_vmem [thread:$0]  %s575_s2, 512, %s40_s25, [#allocation7], %s488_s18, %s488_s18, %s489_s19  }
  0x22   :  { %481 = dma.done.wait [#allocation4], 128  }
  0x23   :  { %482 = vsyncadd [#allocation4], 4294967168 }
  0x24   :  { %483 = dma.done.wait [#allocation7], 2560  }
  0x25   :  { %484 = vsyncadd [#allocation7], 4294964736  ;;  %v492_v0 = vmov 0.0   ;;  %vm493_vm0 = vmmov 0   ;;  %v67_v1 = vld [vmem:[#allocation8 + $0x18] sm:$0xff]  ;;  %v66_v2 = vld [vmem:[#allocation8 + $0x10] sm:$0xff] }
  0x26   :  { %357 = vmatprep.subr.mxu0 %v492_v0  ;;  %389 = vmatprep.mubr.msk.f32.mxu0 %vm493_vm0, %v492_v0  ;;  %vm71_vm1 = vnez %v67_v1  ;;  %v494_v3 = vmov 0   ;;  %vm70_vm2 = vnez %v66_v2  ;;  %v87_v23 = vld [vmem:[#allocation6 + $0x78] sm:$0xff]  ;;  %v65_v28 = vld [vmem:[#allocation8 + $0x8] sm:$0xff]  ;;  %v86_v31 = vld [vmem:[#allocation6 + $0x70] sm:$0xff]  ;;  %s495_s5 = smov [#allocation9]  }
  0x27   :  { %v91_v4 = vsel %vm71_vm1, 16843009, %v494_v3  ;;  %v90_v9 = vsel %vm70_vm2, 16843009, %v494_v3  ;;  %vm69_vm9 = vnez %v65_v28  ;;  %v85_v38 = vld [vmem:[#allocation6 + $0x68] sm:$0xff]  ;;  %v84_v44 = vld [vmem:[#allocation6 + $0x60] sm:$0xff] }
  0x28   :  { %v107_v5 = vunpack.c.3.s8 %v91_v4  ;;  %v106_v6 = vunpack.c.2.s8 %v91_v4  ;;  %v105_v7 = vunpack.c.1.s8 %v91_v4  ;;  %v104_v8 = vunpack.c.0.s8 %v91_v4  ;;  %v83_v50 = vld [vmem:[#allocation6 + $0x58] sm:$0xff]  ;;  %v64_v53 = vld [vmem:[#allocation8] sm:$0xff]  ;;  %v82_v57 = vld [vmem:[#allocation6 + $0x50] sm:$0xff]  ;;  %s313_s6 = sshll.u32 %s495_s5, 4  ;;  %s314_s6 = int_to_ptr.vmem [resolvable:$true] %s313_s6 }
  0x29   :  { %v103_v14 = vunpack.c.3.s8 %v90_v9  ;;  %v102_v19 = vunpack.c.2.s8 %v90_v9  ;;  %v101_v27 = vunpack.c.1.s8 %v90_v9  ;;  %v100_v36 = vunpack.c.0.s8 %v90_v9  ;;  %v81_v1 = vld [vmem:[#allocation6 + $0x48] sm:$0xff]  ;;  %s461_s7 = scalar_lea.vmem %s314_s6, 128  ;;  %p466_p2 = scmp.lt.s32.totalorder %s314_s6, %s314_s6 }
  0x2a   :  { %v138_v10 = vpack.c.b16 %v107_v5, %v107_v5  ;;  %v136_v11 = vpack.c.b16 %v106_v6, %v106_v6  ;;  %v134_v12 = vpack.c.b16 %v105_v7, %v105_v7  ;;  %v132_v13 = vpack.c.b16 %v104_v8, %v104_v8  ;;  %v80_v8 = vld [vmem:[#allocation6 + $0x40] sm:$0xff]  ;;  %p462_p1 = scmp.ne.s32.totalorder %s314_s6, %s461_s7  ;;  %p467_p3 = scmp.lt.s32.totalorder %s461_s7, %s461_s7 }
  0x2b   :  { %v130_v20 = vpack.c.b16 %v103_v14, %v103_v14  ;;  %v128_v30 = vpack.c.b16 %v102_v19, %v102_v19  ;;  %v126_v35 = vpack.c.b16 %v101_v27, %v101_v27  ;;  %v89_v37 = vsel %vm69_vm9, 16843009, %v494_v3  ;;  %v79_v14 = vld [vmem:[#allocation6 + $0x38] sm:$0xff] }
  0x2c   :  { %v139_v15 = vpack.c.b8 %v138_v10, %v138_v10  ;;  %v137_v16 = vpack.c.b8 %v136_v11, %v136_v11  ;;  %v135_v17 = vpack.c.b8 %v134_v12, %v134_v12  ;;  %v133_v18 = vpack.c.b8 %v132_v13, %v132_v13  ;;  %p468_p4 = por %p467_p3, %p466_p2 }
  0x2d   :  { %v131_v29 = vpack.c.b8 %v130_v20, %v130_v20  ;;  %v129_v34 = vpack.c.b8 %v128_v30, %v128_v30  ;;  %v127_v41 = vpack.c.b8 %v126_v35, %v126_v35  ;;  %v124_v42 = vpack.c.b16 %v100_v36, %v100_v36  ;;  %v78_v20 = vld [vmem:[#allocation6 + $0x30] sm:$0xff]  ;;  %v75_v35 = vld [vmem:[#allocation6 + $0x18] sm:$0xff] }
  0x2e   :  { %vm155_vm3 = vnez %v139_v15  ;;  %vm154_vm4 = vnez %v137_v16  ;;  %vm153_vm5 = vnez %v135_v17  ;;  %vm152_vm7 = vnez %v133_v18  ;;  %p469_p5 = pnand %p468_p4, %p462_p1 }
  0x2f   :  { %v171_v21 = vsel %vm155_vm3, 16843009, %v494_v3  ;;  %v170_v22 = vsel %vm154_vm4, 16843009, %v494_v3  ;;  %v169_v26 = vsel %vm153_vm5, 16843009, %v494_v3  ;;  %vm151_vm10 = vnez %v131_v29 }
  0x30   :  { %v187_v24 = vunpack.c.0.s8 %v171_v21  ;;  %v186_v25 = vunpack.c.0.s8 %v170_v22  ;;  %v185_v32 = vunpack.c.0.s8 %v169_v26  ;;  %v168_v33 = vsel %vm152_vm7, 16843009, %v494_v3  ;;  %v77_v26 = vld [vmem:[#allocation6 + $0x28] sm:$0xff] }
  0x31   :  { %v184_v39 = vunpack.c.0.s8 %v168_v33  ;;  %v167_v40 = vsel %vm151_vm10, 16843009, %v494_v3  ;;  %vm150_vm12 = vnez %v129_v34  ;;  %v99_v43 = vunpack.c.3.s8 %v89_v37 }
  0x32   :  { %vm203_vm6 = vcmp.ne.s32.totalorder %v187_v24, 0  ;;  %vm202_vm8 = vcmp.ne.s32.totalorder %v186_v25, 0  ;;  %vm201_vm11 = vcmp.ne.s32.totalorder %v185_v32, 0  ;;  %v183_v45 = vunpack.c.0.s8 %v167_v40 }
  0x33   :  { %358 = vmatpush3.xpose.msk.msra.mxu0 %vm203_vm6, %v87_v23  ;;  %vm200_vm13 = vcmp.ne.s32.totalorder %v184_v39, 0  ;;  %v166_v46 = vsel %vm150_vm12, 16843009, %v494_v3  ;;  %vm149_vm14 = vnez %v127_v41  ;;  %v125_v47 = vpack.c.b8 %v124_v42, %v124_v42  ;;  %v73_v41 = vld [vmem:[#allocation6 + $0x8] sm:$0xff] }
  0x34   :  { %359 = vmatprep.subr.mxu0 %v492_v0  ;;  %v122_v48 = vpack.c.b16 %v99_v43, %v99_v43  ;;  %v98_v49 = vunpack.c.2.s8 %v89_v37  ;;  %vm199_vm15 = vcmp.ne.s32.totalorder %v183_v45, 0  ;;  %v182_v51 = vunpack.c.0.s8 %v166_v46  ;;  %v72_v43 = vld [vmem:[#allocation6] sm:$0xff]  ;;  %v339_v45 = vld [vmem:[%s576_s3] ss:$0 sm:$0xff] }
  0x35   :  { %v165_v52 = vsel %vm149_vm14, 16843009, %v494_v3  ;;  %vm148_vm0 = vnez %v125_v47  ;;  %v97_v56 = vunpack.c.1.s8 %v89_v37  ;;  %vm68_vm2 = vnez %v64_v53 }
  0x36   :  { %v123_v54 = vpack.c.b8 %v122_v48, %v122_v48  ;;  %v120_v55 = vpack.c.b16 %v98_v49, %v98_v49  ;;  %vm198_vm1 = vcmp.ne.s32.totalorder %v182_v51, 0  ;;  %v181_v58 = vunpack.c.0.s8 %v165_v52 }
  0x37   :  { %360 = vmatpush3.xpose.msk.msra.mxu0 %vm202_vm8, %v86_v31  ;;  %v164_v59 = vsel %vm148_vm0, 16843009, %v494_v3  ;;  %v118_v61 = vpack.c.b16 %v97_v56, %v97_v56  ;;  %v96_v62 = vunpack.c.0.s8 %v89_v37  ;;  %v88_v63 = vsel %vm68_vm2, 16843009, %v494_v3  ;;  %v76_v31 = vld [vmem:[#allocation6 + $0x20] sm:$0xff] }
  0x38   :  { %361 = vmatprep.subr.mxu0 %v492_v0  ;;  %vm147_vm3 = vnez %v123_v54  ;;  %v121_v60 = vpack.c.b8 %v120_v55, %v120_v55  ;;  %vm197_vm4 = vcmp.ne.s32.totalorder %v181_v58, 0  ;;  %v180_v2 = vunpack.c.0.s8 %v164_v59 }
  0x39   :  { %v163_v4 = vsel %vm147_vm3, 16843009, %v494_v3  ;;  %v119_v5 = vpack.c.b8 %v118_v61, %v118_v61  ;;  %v116_v6 = vpack.c.b16 %v96_v62, %v96_v62  ;;  %v95_v7 = vunpack.c.3.s8 %v88_v63 }
  0x3a   :  { %vm146_vm5 = vnez %v121_v60  ;;  %vm196_vm6 = vcmp.ne.s32.totalorder %v180_v2, 0  ;;  %v179_v9 = vunpack.c.0.s8 %v163_v4  ;;  %v94_v13 = vunpack.c.2.s8 %v88_v63 }
  0x3b   :  { %362 = vmatpush3.xpose.msk.msra.mxu0 %vm201_vm11, %v85_v38  ;;  %v162_v10 = vsel %vm146_vm5, 16843009, %v494_v3  ;;  %vm145_vm7 = vnez %v119_v5  ;;  %v117_v11 = vpack.c.b8 %v116_v6, %v116_v6  ;;  %v114_v12 = vpack.c.b16 %v95_v7, %v95_v7  ;;  %v74_v38 = vld [vmem:[#allocation6 + $0x10] sm:$0xff] }
  0x3c   :  { %363 = vmatprep.subr.mxu0 %v492_v0  ;;  %vm195_vm8 = vcmp.ne.s32.totalorder %v179_v9, 0  ;;  %v178_v15 = vunpack.c.0.s8 %v162_v10  ;;  %v161_v16 = vsel %vm145_vm7, 16843009, %v494_v3  ;;  %v112_v18 = vpack.c.b16 %v94_v13, %v94_v13 }
  0x3d   :  { %vm144_vm9 = vnez %v117_v11  ;;  %v115_v17 = vpack.c.b8 %v114_v12, %v114_v12  ;;  %v93_v19 = vunpack.c.1.s8 %v88_v63  ;;  %v177_v21 = vunpack.c.0.s8 %v161_v16 }
  0x3e   :  { %vm194_vm10 = vcmp.ne.s32.totalorder %v178_v15, 0  ;;  %v160_v22 = vsel %vm144_vm9, 16843009, %v494_v3  ;;  %v113_v23 = vpack.c.b8 %v112_v18, %v112_v18  ;;  %v92_v25 = vunpack.c.0.s8 %v88_v63 }
  0x3f   :  { %364 = vmatpush3.xpose.msk.msra.mxu0 %vm200_vm13, %v84_v44  ;;  %vm143_vm11 = vnez %v115_v17  ;;  %v110_v24 = vpack.c.b16 %v93_v19, %v93_v19  ;;  %vm193_vm12 = vcmp.ne.s32.totalorder %v177_v21, 0  ;;  %v176_v27 = vunpack.c.0.s8 %v160_v22  ;;  %v221_v44 = vld [vmem:[#allocation3] sm:$0xff] }
  0x40   :  { %365 = vmatprep.subr.mxu0 %v492_v0  ;;  %v159_v28 = vsel %vm143_vm11, 16843009, %v494_v3  ;;  %vm142_vm13 = vnez %v113_v23  ;;  %v108_v30 = vpack.c.b16 %v92_v25, %v92_v25 }
  0x41   :  { %v111_v29 = vpack.c.b8 %v110_v24, %v110_v24  ;;  %vm192_vm14 = vcmp.ne.s32.totalorder %v176_v27, 0  ;;  %v175_v32 = vunpack.c.0.s8 %v159_v28  ;;  %v158_v33 = vsel %vm142_vm13, 16843009, %v494_v3 }
  0x42   :  { %v109_v34 = vpack.c.b8 %v108_v30, %v108_v30  ;;  %v174_v36 = vunpack.c.0.s8 %v158_v33 }
  0x43   :  { %366 = vmatpush3.xpose.msk.msra.mxu0 %vm199_vm15, %v83_v50  ;;  %vm141_vm15 = vnez %v111_v29  ;;  %vm191_vm0 = vcmp.ne.s32.totalorder %v175_v32, 0 }
  0x44   :  { %367 = vmatprep.subr.mxu0 %v492_v0  ;;  %v157_v37 = vsel %vm141_vm15, 16843009, %v494_v3  ;;  %vm190_vm2 = vcmp.ne.s32.totalorder %v174_v36, 0 }
  0x45   :  { %v173_v39 = vunpack.c.0.s8 %v157_v37 }
  0x47   :  { %368 = vmatpush3.xpose.msk.msra.mxu0 %vm198_vm1, %v82_v57  ;;  %vm140_vm1 = vnez %v109_v34  ;;  %vm189_vm3 = vcmp.ne.s32.totalorder %v173_v39, 0 }
  0x48   :  { %369 = vmatprep.subr.mxu0 %v492_v0  ;;  %v156_v40 = vsel %vm140_vm1, 16843009, %v494_v3 }
  0x49   :  { %v172_v42 = vunpack.c.0.s8 %v156_v40 }
  0x4b   :  { %370 = vmatpush3.xpose.msk.msra.mxu0 %vm197_vm4, %v81_v1  ;;  %vm188_vm4 = vcmp.ne.s32.totalorder %v172_v42, 0 }
  0x4c   :  { %371 = vmatprep.subr.mxu0 %v492_v0 }
  0x4f   :  { %372 = vmatpush3.xpose.msk.msra.mxu0 %vm196_vm6, %v80_v8 }
  0x50   :  { %373 = vmatprep.subr.mxu0 %v492_v0 }
  0x53   :  { %374 = vmatpush3.xpose.msk.msra.mxu0 %vm195_vm8, %v79_v14 }
  0x54   :  { %375 = vmatprep.subr.mxu0 %v492_v0 }
  0x57   :  { %376 = vmatpush3.xpose.msk.msra.mxu0 %vm194_vm10, %v78_v20 }
  0x58   :  { %377 = vmatprep.subr.mxu0 %v492_v0 }
  0x5b   :  { %378 = vmatpush3.xpose.msk.msra.mxu0 %vm193_vm12, %v77_v26 }
  0x5c   :  { %379 = vmatprep.subr.mxu0 %v492_v0 }
  0x5f   :  { %380 = vmatpush3.xpose.msk.msra.mxu0 %vm192_vm14, %v76_v31 }
  0x60   :  { %381 = vmatprep.subr.mxu0 %v492_v0 }
  0x63   :  { %382 = vmatpush3.xpose.msk.msra.mxu0 %vm191_vm0, %v75_v35 }
  0x64   :  { %383 = vmatprep.subr.mxu0 %v492_v0 }
  0x67   :  { %384 = vmatpush3.xpose.msk.msra.mxu0 %vm190_vm2, %v74_v38 }
  0x68   :  { %385 = vmatprep.subr.mxu0 %v492_v0 }
  0x6b   :  { %386 = vmatpush3.xpose.msk.msra.mxu0 %vm189_vm3, %v73_v41 }
  0x6c   :  { %387 = vmatprep.subr.mxu0 %v492_v0 }
  0x6f   :  { %388 = vmatpush3.xpose.msk.msra.mxu0 %vm188_vm4, %v72_v43 }
  0x72   :  { %390 = vmatmul.mubr.f32.vlgmr.msra.gmra.mxu0 %v221_v44 }
 0x132   :  { %v288_v3 = vpop.f32.mrf.mxu0 }
 0x133   :  { %v305_v46 = vadd.f32 %v339_v45, %v288_v3 }
 0x134   :  { %v391_v47 = vpop.f32.mrf.mxu0 }
 0x135   :  { %306 = vst [vmem:[#allocation9] sm:$0xff] %v305_v46 }
 0x136   :  { %472 = shalt.err (!%p469_p5)
}
 0x137   :  { %316 = dma.vmem_to_hbm [thread:$0]  %s314_s6, 128, %s577_s4, [#allocation5]  }
 0x138   :  { %485 = dma.done.wait [#allocation5], 128  }
 0x139   :  { %486 = vsyncadd [#allocation5], 4294967168 }
 0x13a   :  { %320 = vsyncpa [#allocation4], 1 }
 0x13b   :  { %321 = vsyncpa [#allocation7], 1 }
 0x13c   :  { %322 = vsyncpa [#allocation5], 1 }

</bundles_post_ra>
